<compile_context>
chip_gen: v7x
topology: tpu7x:2x2x1
jax: 0.10.0
libtpu: 0.0.40
codegen_flags: <defaults>
</compile_context>

<pallas_src>
import jax
import jax.numpy as jnp
from jax import lax
from jax.experimental import pallas as pl
from jax.experimental.pallas import tpu as pltpu

LANE = 128  # TPU lane width: output slab is padded to a multiple of this.


def rnn_kernel(x_ref, wih_ref, whh_ref, b_ref, wfc_ref, bfc_ref, out_ref, xw_ref):
    """Whole RNN forward in one kernel invocation (no time grid).

    x_ref   : (T*B, I)   time-major flattened input
    wih_ref : (I, H)     W_ih^T
    whh_ref : (H, H)     W_hh^T
    b_ref   : (1, H)     b_ih + b_hh
    wfc_ref : (H, Opad)  W_fc^T zero-padded on the lane axis
    bfc_ref : (1, Opad)  b_fc zero-padded on the lane axis
    out_ref : (B, Opad)  sigmoid(h_T @ W_fc^T + b_fc), lane-dense store
    xw_ref  : (T*B, H)   VMEM scratch for the hoisted input projection
    """
    TB = x_ref.shape[0]
    B = out_ref.shape[0]
    H = whh_ref.shape[0]
    T = TB // B

    # Hoisted input projection: one MXU pass covering all timesteps instead of
    # T tiny serialized (B,I)@(I,H) matmuls on the recurrent critical path.
    xw_ref[...] = (
        jnp.dot(x_ref[...], wih_ref[...], preferred_element_type=jnp.float32)
        + b_ref[...]
    )

    whh = whh_ref[...]  # loop-invariant recurrent weight, loaded once
    h = jnp.zeros((B, H), dtype=jnp.float32)

    # Fully-unrolled static time loop: each step's serial path is a single
    # matmul + tanh. Static slice starts (t*B) keep the loads trivially legal.
    for t in range(T):
        xw_t = xw_ref[pl.ds(t * B, B), :]  # (B, H)
        h = jnp.tanh(xw_t + jnp.dot(h, whh, preferred_element_type=jnp.float32))

    logits = (
        jnp.dot(h, wfc_ref[...], preferred_element_type=jnp.float32) + bfc_ref[...]
    )
    # sigmoid(x) == 0.5 * (tanh(x / 2) + 1): single EUP tanh, no exp + divide.
    out_ref[...] = 0.5 * (jnp.tanh(0.5 * logits) + 1.0)


def rnn_model_forward(x_btI, w_ih, w_hh, b_ih, b_hh, w_fc, b_fc):
    """x_btI: (B, T, I) float32 (PyTorch batch_first layout). Returns (B, O)."""
    B, T, I = x_btI.shape
    H = w_ih.shape[0]
    O = w_fc.shape[0]
    o_pad = ((O + LANE - 1) // LANE) * LANE  # lane-dense output width

    # Time-major flatten so the hoisted projection is one matmul and each
    # timestep is a contiguous (B, H) row block of the scratch.
    # TODO(synk): if the producer of x can emit time-major data directly, this
    # wrapper-side transpose disappears entirely.
    x_flat = jnp.transpose(x_btI, (1, 0, 2)).reshape(T * B, I)

    wih_t = w_ih.T                              # (I, H)
    whh_t = w_hh.T                              # (H, H)
    b_sum = (b_ih + b_hh).reshape(1, H)         # (1, H)
    wfc_pad = jnp.zeros((H, o_pad), jnp.float32).at[:, :O].set(w_fc.T)
    bfc_pad = jnp.zeros((1, o_pad), jnp.float32).at[:, :O].set(b_fc.reshape(1, O))
    # NOTE: weights stay fp32 here (tiny shapes, and fp32 keeps elementwise/EUP
    # math native on v5e). At large H, cast MXU operands to bf16 and set an
    # explicit vmem_limit_bytes to fit v7x's 64 MiB VMEM.

    vmem = pl.BlockSpec(memory_space=pltpu.MemorySpace.VMEM)

    out_pad = pl.pallas_call(
        rnn_kernel,
        out_shape=jax.ShapeDtypeStruct((B, o_pad), jnp.float32),
        in_specs=[vmem] * 6,
        out_specs=vmem,
        scratch_shapes=[pltpu.VMEM((T * B, H), jnp.float32)],
    )(x_flat, wih_t, whh_t, b_sum, wfc_pad, bfc_pad)

    return out_pad[:, :O]


def rnn_model_reference(x_btI, w_ih, w_hh, b_ih, b_hh, w_fc, b_fc):
    """Pure-JAX reference of the PyTorch forward (for correctness check)."""
    B, T, I = x_btI.shape
    H = w_ih.shape[0]

    def step(h, x_t):
        h_new = jnp.tanh(x_t @ w_ih.T + b_ih + h @ w_hh.T + b_hh)
        return h_new, None

    h_last, _ = lax.scan(step, jnp.zeros((B, H), jnp.float32),
                         jnp.transpose(x_btI, (1, 0, 2)))
    return jax.nn.sigmoid(h_last @ w_fc.T + b_fc)


if __name__ == "__main__":
    # Small shapes consistent with the module: batch=2, seq=8, input=16,
    # hidden=32, output=4.
    B, T, I, H, O = 2, 8, 16, 32, 4

    key = jax.random.PRNGKey(0)
    keys = jax.random.split(key, 7)
    bound = 1.0 / jnp.sqrt(jnp.float32(H))  # PyTorch-style uniform init range

    x = jax.random.normal(keys[0], (B, T, I), dtype=jnp.float32)
    w_ih = jax.random.uniform(keys[1], (H, I), jnp.float32, -bound, bound)
    w_hh = jax.random.uniform(keys[2], (H, H), jnp.float32, -bound, bound)
    b_ih = jax.random.uniform(keys[3], (H,), jnp.float32, -bound, bound)
    b_hh = jax.random.uniform(keys[4], (H,), jnp.float32, -bound, bound)
    w_fc = jax.random.uniform(keys[5], (O, H), jnp.float32, -bound, bound)
    b_fc = jax.random.uniform(keys[6], (O,), jnp.float32, -bound, bound)

    out = rnn_model_forward(x, w_ih, w_hh, b_ih, b_hh, w_fc, b_fc)
    out = jax.block_until_ready(out)

    ref = jax.block_until_ready(
        rnn_model_reference(x, w_ih, w_hh, b_ih, b_hh, w_fc, b_fc)
    )
    assert out.shape == (B, O)
    assert jnp.allclose(out, ref, atol=1e-5, rtol=1e-5), (out, ref)

    print("KERNEL_OK")
</pallas_src>

<mosaic_0001>
module attributes {stable_mosaic.version = 11 : i64} {
  func.func @rnn_kernel(%arg0: memref<16x16xf32, #tpu.memory_space<vmem>>, %arg1: memref<16x32xf32, #tpu.memory_space<vmem>>, %arg2: memref<32x32xf32, #tpu.memory_space<vmem>>, %arg3: memref<1x32xf32, #tpu.memory_space<vmem>>, %arg4: memref<32x128xf32, #tpu.memory_space<vmem>>, %arg5: memref<1x128xf32, #tpu.memory_space<vmem>>, %arg6: memref<2x128xf32, #tpu.memory_space<vmem>>, %arg7: memref<16x32xf32, #tpu.memory_space<vmem>>) attributes {dimension_semantics = [], scalar_prefetch = 0 : i64, scratch_operands = 1 : i64, tpu.core_type = #tpu.core_type<tc>} {
    %c0 = arith.constant 0 : index
    %c0_0 = arith.constant 0 : index
    %0 = vector.load %arg0[%c0, %c0_0] : memref<16x16xf32, #tpu.memory_space<vmem>>, vector<16x16xf32>
    %c0_1 = arith.constant 0 : index
    %c0_2 = arith.constant 0 : index
    %1 = vector.load %arg1[%c0_1, %c0_2] : memref<16x32xf32, #tpu.memory_space<vmem>>, vector<16x32xf32>
    %cst = arith.constant dense<0.000000e+00> : vector<16x32xf32>
    %2 = tpu.matmul %0, %1, %cst {dimension_numbers = #tpu.dot_dimension_numbers<[1], [0], [0], [1], [0, 0, 1, 1], [], []>} : vector<16x16xf32>, vector<16x32xf32>, vector<16x32xf32> -> vector<16x32xf32>
    %c0_3 = arith.constant 0 : index
    %c0_4 = arith.constant 0 : index
    %3 = vector.load %arg3[%c0_3, %c0_4] : memref<1x32xf32, #tpu.memory_space<vmem>>, vector<1x32xf32>
    %4 = vector.broadcast %3 : vector<1x32xf32> to vector<16x32xf32>
    %5 = arith.addf %2, %4 : vector<16x32xf32>
    %c0_5 = arith.constant 0 : index
    %c0_6 = arith.constant 0 : index
    %6 = vector.load %arg7[%c0_5, %c0_6] : memref<16x32xf32, #tpu.memory_space<vmem>>, vector<16x32xf32>
    tpu.vector_store %arg7[%c0_5, %c0_6], %5 {strides = array<i32>} : memref<16x32xf32, #tpu.memory_space<vmem>>, vector<16x32xf32>,
    %c0_7 = arith.constant 0 : index
    %c0_8 = arith.constant 0 : index
    %7 = vector.load %arg2[%c0_7, %c0_8] : memref<32x32xf32, #tpu.memory_space<vmem>>, vector<32x32xf32>
    %cst_9 = arith.constant 0.000000e+00 : f32
    %8 = vector.broadcast %cst_9 : f32 to vector<2x32xf32>
    %c0_10 = arith.constant 0 : index
    %c0_11 = arith.constant 0 : index
    %9 = vector.load %arg7[%c0_10, %c0_11] : memref<16x32xf32, #tpu.memory_space<vmem>>, vector<2x32xf32>
    %cst_12 = arith.constant dense<0.000000e+00> : vector<2x32xf32>
    %10 = tpu.matmul %8, %7, %cst_12 {dimension_numbers = #tpu.dot_dimension_numbers<[1], [0], [0], [1], [0, 0, 1, 1], [], []>} : vector<2x32xf32>, vector<32x32xf32>, vector<2x32xf32> -> vector<2x32xf32>
    %11 = arith.addf %9, %10 : vector<2x32xf32>
    %12 = math.tanh %11 : vector<2x32xf32>
    %c2 = arith.constant 2 : index
    %c0_13 = arith.constant 0 : index
    %13 = vector.load %arg7[%c2, %c0_13] : memref<16x32xf32, #tpu.memory_space<vmem>>, vector<2x32xf32>
    %cst_14 = arith.constant dense<0.000000e+00> : vector<2x32xf32>
    %14 = tpu.matmul %12, %7, %cst_14 {dimension_numbers = #tpu.dot_dimension_numbers<[1], [0], [0], [1], [0, 0, 1, 1], [], []>} : vector<2x32xf32>, vector<32x32xf32>, vector<2x32xf32> -> vector<2x32xf32>
    %15 = arith.addf %13, %14 : vector<2x32xf32>
    %16 = math.tanh %15 : vector<2x32xf32>
    %c4 = arith.constant 4 : index
    %c0_15 = arith.constant 0 : index
    %17 = vector.load %arg7[%c4, %c0_15] : memref<16x32xf32, #tpu.memory_space<vmem>>, vector<2x32xf32>
    %cst_16 = arith.constant dense<0.000000e+00> : vector<2x32xf32>
    %18 = tpu.matmul %16, %7, %cst_16 {dimension_numbers = #tpu.dot_dimension_numbers<[1], [0], [0], [1], [0, 0, 1, 1], [], []>} : vector<2x32xf32>, vector<32x32xf32>, vector<2x32xf32> -> vector<2x32xf32>
    %19 = arith.addf %17, %18 : vector<2x32xf32>
    %20 = math.tanh %19 : vector<2x32xf32>
    %c6 = arith.constant 6 : index
    %c0_17 = arith.constant 0 : index
    %21 = vector.load %arg7[%c6, %c0_17] : memref<16x32xf32, #tpu.memory_space<vmem>>, vector<2x32xf32>
    %cst_18 = arith.constant dense<0.000000e+00> : vector<2x32xf32>
    %22 = tpu.matmul %20, %7, %cst_18 {dimension_numbers = #tpu.dot_dimension_numbers<[1], [0], [0], [1], [0, 0, 1, 1], [], []>} : vector<2x32xf32>, vector<32x32xf32>, vector<2x32xf32> -> vector<2x32xf32>
    %23 = arith.addf %21, %22 : vector<2x32xf32>
    %24 = math.tanh %23 : vector<2x32xf32>
    %c8 = arith.constant 8 : index
    %c0_19 = arith.constant 0 : index
    %25 = vector.load %arg7[%c8, %c0_19] : memref<16x32xf32, #tpu.memory_space<vmem>>, vector<2x32xf32>
    %cst_20 = arith.constant dense<0.000000e+00> : vector<2x32xf32>
    %26 = tpu.matmul %24, %7, %cst_20 {dimension_numbers = #tpu.dot_dimension_numbers<[1], [0], [0], [1], [0, 0, 1, 1], [], []>} : vector<2x32xf32>, vector<32x32xf32>, vector<2x32xf32> -> vector<2x32xf32>
    %27 = arith.addf %25, %26 : vector<2x32xf32>
    %28 = math.tanh %27 : vector<2x32xf32>
    %c10 = arith.constant 10 : index
    %c0_21 = arith.constant 0 : index
    %29 = vector.load %arg7[%c10, %c0_21] : memref<16x32xf32, #tpu.memory_space<vmem>>, vector<2x32xf32>
    %cst_22 = arith.constant dense<0.000000e+00> : vector<2x32xf32>
    %30 = tpu.matmul %28, %7, %cst_22 {dimension_numbers = #tpu.dot_dimension_numbers<[1], [0], [0], [1], [0, 0, 1, 1], [], []>} : vector<2x32xf32>, vector<32x32xf32>, vector<2x32xf32> -> vector<2x32xf32>
    %31 = arith.addf %29, %30 : vector<2x32xf32>
    %32 = math.tanh %31 : vector<2x32xf32>
    %c12 = arith.constant 12 : index
    %c0_23 = arith.constant 0 : index
    %33 = vector.load %arg7[%c12, %c0_23] : memref<16x32xf32, #tpu.memory_space<vmem>>, vector<2x32xf32>
    %cst_24 = arith.constant dense<0.000000e+00> : vector<2x32xf32>
    %34 = tpu.matmul %32, %7, %cst_24 {dimension_numbers = #tpu.dot_dimension_numbers<[1], [0], [0], [1], [0, 0, 1, 1], [], []>} : vector<2x32xf32>, vector<32x32xf32>, vector<2x32xf32> -> vector<2x32xf32>
    %35 = arith.addf %33, %34 : vector<2x32xf32>
    %36 = math.tanh %35 : vector<2x32xf32>
    %c14 = arith.constant 14 : index
    %c0_25 = arith.constant 0 : index
    %37 = vector.load %arg7[%c14, %c0_25] : memref<16x32xf32, #tpu.memory_space<vmem>>, vector<2x32xf32>
    %cst_26 = arith.constant dense<0.000000e+00> : vector<2x32xf32>
    %38 = tpu.matmul %36, %7, %cst_26 {dimension_numbers = #tpu.dot_dimension_numbers<[1], [0], [0], [1], [0, 0, 1, 1], [], []>} : vector<2x32xf32>, vector<32x32xf32>, vector<2x32xf32> -> vector<2x32xf32>
    %39 = arith.addf %37, %38 : vector<2x32xf32>
    %40 = math.tanh %39 : vector<2x32xf32>
    %c0_27 = arith.constant 0 : index
    %c0_28 = arith.constant 0 : index
    %41 = vector.load %arg4[%c0_27, %c0_28] : memref<32x128xf32, #tpu.memory_space<vmem>>, vector<32x128xf32>
    %cst_29 = arith.constant dense<0.000000e+00> : vector<2x128xf32>
    %42 = tpu.matmul %40, %41, %cst_29 {dimension_numbers = #tpu.dot_dimension_numbers<[1], [0], [0], [1], [0, 0, 1, 1], [], []>} : vector<2x32xf32>, vector<32x128xf32>, vector<2x128xf32> -> vector<2x128xf32>
    %c0_30 = arith.constant 0 : index
    %c0_31 = arith.constant 0 : index
    %43 = vector.load %arg5[%c0_30, %c0_31] : memref<1x128xf32, #tpu.memory_space<vmem>>, vector<1x128xf32>
    %44 = vector.broadcast %43 : vector<1x128xf32> to vector<2x128xf32>
    %45 = arith.addf %42, %44 : vector<2x128xf32>
    %cst_32 = arith.constant 5.000000e-01 : f32
    %46 = vector.broadcast %cst_32 : f32 to vector<2x128xf32>
    %47 = arith.mulf %46, %45 : vector<2x128xf32>
    %48 = math.tanh %47 : vector<2x128xf32>
    %cst_33 = arith.constant 1.000000e+00 : f32
    %49 = vector.broadcast %cst_33 : f32 to vector<2x128xf32>
    %50 = arith.addf %48, %49 : vector<2x128xf32>
    %cst_34 = arith.constant 5.000000e-01 : f32
    %51 = vector.broadcast %cst_34 : f32 to vector<2x128xf32>
    %52 = arith.mulf %51, %50 : vector<2x128xf32>
    %c0_35 = arith.constant 0 : index
    %c0_36 = arith.constant 0 : index
    %53 = vector.load %arg6[%c0_35, %c0_36] : memref<2x128xf32, #tpu.memory_space<vmem>>, vector<2x128xf32>
    tpu.vector_store %arg6[%c0_35, %c0_36], %52 {strides = array<i32>} : memref<2x128xf32, #tpu.memory_space<vmem>>, vector<2x128xf32>,
    return
  }
}

</mosaic_0001>

<bundles_post_ra>
// kernel: tpu_custom_call.1
= control target key start
LH: loop header
LB: loop body
LE: loop exit
PB: predicated region body
PF: predicated region fallthrough
CT: control target
= control target key end

     0   :  { %11 = vsyncpa [#allocation4], 0  ;;  %s1470_s0 = inlined_call_operand.hbm [shape: f32[16,16], index: 0, kind: input, shape index: {}]   ;;  %s1471_s1 = inlined_call_operand.hbm [shape: f32[16,32], index: 1, kind: input, shape index: {}]   ;;  %s1472_s2 = inlined_call_operand.hbm [shape: f32[32,32], index: 2, kind: input, shape index: {}]   ;;  %s1473_s3 = inlined_call_operand.vmem [shape: f32[1,32], index: 3, kind: input, shape index: {}]   ;;  %s1474_s4 = inlined_call_operand.hbm [shape: f32[32,128], index: 4, kind: input, shape index: {}]   ;;  %s1475_s5 = inlined_call_operand.vmem [shape: f32[1,128], index: 5, kind: input, shape index: {}]   ;;  %s1476_s6 = inlined_call_operand.hbm [shape: f32[2,128], index: 6, kind: output, shape index: {}]  }
   0x1   :  { %12 = vsyncpa [#allocation7], 0 }
   0x2   :  { %13 = vsyncpa [#allocation10], 0 }
   0x3   :  { %14 = vsyncpa [#allocation5], 0  ;;  %s1264_s21 = smov [#allocation6]   ;;  %s1265_s23 = smov [#allocation3]  }
   0x4   :  { %s32_s22 = sshll.u32 %s1264_s21, 4  ;;  %s20_s24 = sshll.u32 %s1265_s23, 4  ;;  %s33_s22 = int_to_ptr.vmem [resolvable:$true] %s32_s22  ;;  %s1309_s24 = int_to_ptr.vmem [resolvable:$true] %s20_s24 }
   0x5   :  { %s1146_s27 = scalar_lea.hbm %s1471_s1, 256 }
   0x6   :  { %p1147_p0 = scmp.ne.s32.totalorder %s1471_s1, %s1146_s27  ;;  %p1150_p1 = scmp.lt.u32.totalorder %s1146_s27, %s1471_s1 }
   0x8   :  { %p1152_p2 = pnand %p1150_p1, %p1147_p0 }
   0xa   :  { %1155 = shalt.err (!%p1152_p2)
}
   0xb   :  { %s1156_s8 = scalar_lea.vmem %s33_s22, 256  ;;  %p1161_p4 = scmp.lt.s32.totalorder %s33_s22, %s33_s22 }
   0xc   :  { %p1157_p3 = scmp.ne.s32.totalorder %s33_s22, %s1156_s8  ;;  %p1162_p5 = scmp.lt.s32.totalorder %s1156_s8, %s1156_s8 }
   0xe   :  { %p1163_p6 = por %p1162_p5, %p1161_p4 }
  0x10   :  { %p1164_p7 = pnand %p1163_p6, %p1157_p3 }
  0x12   :  { %1167 = shalt.err (!%p1164_p7)
}
  0x13   :  { %s1266_s9 = smov 128   ;;  %s1267_s10 = smov 8  }
  0x14   :  { %38 = dma.hbm_to_vmem [thread:$0]  %s1471_s1, 256, %s33_s22, [#allocation7], %s1266_s9, %s1266_s9, %s1267_s10  }
  0x15   :  { %s1168_s15 = scalar_lea.hbm %s1470_s0, 256 }
  0x16   :  { %p1169_p8 = scmp.ne.s32.totalorder %s1470_s0, %s1168_s15  ;;  %p1172_p9 = scmp.lt.u32.totalorder %s1168_s15, %s1470_s0 }
  0x18   :  { %p1174_p10 = pnand %p1172_p9, %p1169_p8 }
  0x1a   :  { %1177 = shalt.err (!%p1174_p10)
}
  0x1b   :  { %s1178_s20 = scalar_lea.vmem %s1309_s24, 256  ;;  %p1183_p12 = scmp.lt.s32.totalorder %s1309_s24, %s1309_s24 }
  0x1c   :  { %p1179_p11 = scmp.ne.s32.totalorder %s1309_s24, %s1178_s20  ;;  %p1184_p13 = scmp.lt.s32.totalorder %s1178_s20, %s1178_s20 }
  0x1e   :  { %p1185_p0 = por %p1184_p13, %p1183_p12 }
  0x20   :  { %p1186_p1 = pnand %p1185_p0, %p1179_p11 }
  0x22   :  { %1189 = shalt.err (!%p1186_p1)
}
  0x23   :  { %26 = dma.hbm_to_vmem [thread:$0]  %s1470_s0, 256, %s1309_s24, [#allocation4], %s1266_s9, %s1266_s9, %s1267_s10  }
  0x24   :  { %s1268_s22 = smov [#allocation8]   ;;  %s1269_s25 = smov [#allocation9]  }
  0x25   :  { %s44_s23 = sshll.u32 %s1268_s22, 4  ;;  %s58_s26 = sshll.u32 %s1269_s25, 4  ;;  %s45_s23 = int_to_ptr.vmem [resolvable:$true] %s44_s23  ;;  %s1346_s26 = int_to_ptr.vmem [resolvable:$true] %s58_s26 }
  0x26   :  { %s1190_s29 = scalar_lea.hbm %s1472_s2, 512 }
  0x27   :  { %p1191_p2 = scmp.ne.s32.totalorder %s1472_s2, %s1190_s29  ;;  %p1194_p3 = scmp.lt.u32.totalorder %s1190_s29, %s1472_s2 }
  0x29   :  { %p1196_p4 = pnand %p1194_p3, %p1191_p2 }
  0x2b   :  { %1199 = shalt.err (!%p1196_p4)
}
  0x2c   :  { %s1200_s0 = scalar_lea.vmem %s45_s23, 512  ;;  %p1205_p6 = scmp.lt.s32.totalorder %s45_s23, %s45_s23 }
  0x2d   :  { %p1201_p5 = scmp.ne.s32.totalorder %s45_s23, %s1200_s0  ;;  %p1206_p7 = scmp.lt.s32.totalorder %s1200_s0, %s1200_s0 }
  0x2f   :  { %p1207_p8 = por %p1206_p7, %p1205_p6 }
  0x31   :  { %p1208_p9 = pnand %p1207_p8, %p1201_p5 }
  0x33   :  { %1211 = shalt.err (!%p1208_p9)
}
  0x34   :  { %50 = dma.hbm_to_vmem [thread:$0]  %s1472_s2, 512, %s45_s23, [#allocation7], %s1266_s9, %s1266_s9, %s1267_s10  }
  0x35   :  { %s1212_s15 = scalar_lea.hbm %s1474_s4, 512 }
  0x36   :  { %p1213_p10 = scmp.ne.s32.totalorder %s1474_s4, %s1212_s15  ;;  %p1216_p11 = scmp.lt.u32.totalorder %s1212_s15, %s1474_s4 }
  0x38   :  { %p1218_p12 = pnand %p1216_p11, %p1213_p10 }
  0x3a   :  { %1221 = shalt.err (!%p1218_p12)
}
  0x3b   :  { %s1222_s20 = scalar_lea.vmem %s1346_s26, 512  ;;  %p1227_p0 = scmp.lt.s32.totalorder %s1346_s26, %s1346_s26 }
  0x3c   :  { %p1223_p13 = scmp.ne.s32.totalorder %s1346_s26, %s1222_s20  ;;  %p1228_p1 = scmp.lt.s32.totalorder %s1222_s20, %s1222_s20 }
  0x3e   :  { %p1229_p2 = por %p1228_p1, %p1227_p0 }
  0x40   :  { %p1230_p3 = pnand %p1229_p2, %p1223_p13 }
  0x42   :  { %1233 = shalt.err (!%p1230_p3)
}
  0x43   :  { %64 = dma.hbm_to_vmem [thread:$0]  %s1474_s4, 512, %s1346_s26, [#allocation10], %s1266_s9, %s1266_s9, %s1267_s10  }
  0x44   :  { %1256 = dma.done.wait [#allocation4], 256  }
  0x45   :  { %1257 = vsyncadd [#allocation4], 4294967040 }
  0x46   :  { %1258 = dma.done.wait [#allocation7], 768  }
  0x47   :  { %1259 = vsyncadd [#allocation7], 4294966528 }
  0x48   :  { %1260 = dma.done.wait [#allocation10], 512  }
  0x49   :  { %1261 = vsyncadd [#allocation10], 4294966784  ;;  %v1270_v0 = vmov 0.0|0.0   ;;  %vm1271_vm0 = vmmov 0   ;;  %v1272_v1 = vmov 0.0   ;;  %vm90_vm1 = vcmask 130048  }
  0x4a   :  { %1064 = vmatprep.subr.bf16.mxu1 %v1270_v0  ;;  %969 = vmatprep.mubr.msk.f32.mxu1 %vm1271_vm0, %v1272_v1  ;;  %v81_v2 = vld [vmem:[#allocation6] sm:$0xff]  ;;  %v82_v3 = vld [vmem:[#allocation6 + $0x8] sm:$0xff]  ;;  %v79_v4 = vld [vmem:[#allocation3] sm:$0xff]  ;;  %vm172_vm2 = vcmask 261120   ;;  %s1273_s21 = smov [#allocation11]  }
  0x4b   :  { %v1060_v5 = vpack.c.bf16 %v82_v3, %v81_v2  ;;  %958 = vmatprep.mubr.msk.f32.mxu0 %vm90_vm1, %v79_v4  ;;  %v175_v6 = vld [vmem:[#allocation8] sm:$0xff]  ;;  %v176_v7 = vld [vmem:[#allocation8 + $0x8] sm:$0xff]  ;;  %v177_v9 = vld [vmem:[#allocation8 + $0x10] sm:$0xff]  ;;  %s882_s22 = sshll.u32 %s1273_s21, 4  ;;  %s883_s22 = int_to_ptr.vmem [resolvable:$true] %s882_s22 }
  0x4c   :  { %v1387_v8 = vpack.c.bf16 %v176_v7, %v175_v6  ;;  %v178_v10 = vld [vmem:[#allocation8 + $0x18] sm:$0xff]  ;;  %v80_v11 = vld [vmem:[#allocation3 + $0x8] sm:$0xff]  ;;  %v893_v13 = vld [vmem:[%s1473_s3] ss:$0 sm:$0xff]  ;;  %s1234_s23 = scalar_lea.vmem %s883_s22, 32  ;;  %p1239_p5 = scmp.lt.s32.totalorder %s883_s22, %s883_s22 }
  0x4d   :  { %1061 = vmatprep.subr.bf16.mxu0 %v1060_v5  ;;  %v1390_v12 = vpack.c.bf16 %v178_v10, %v177_v9  ;;  %v787_v53 = vld [vmem:[#allocation9] sm:$0xff]  ;;  %v788_v54 = vld [vmem:[#allocation9 + $0x8] sm:$0xff]  ;;  %v789_v55 = vld [vmem:[#allocation9 + $0x10] sm:$0xff]  ;;  %p1235_p4 = scmp.ne.s32.totalorder %s883_s22, %s1234_s23  ;;  %p1240_p6 = scmp.lt.s32.totalorder %s1234_s23, %s1234_s23 }
  0x4e   :  { %1063 = vmatpush3.bf16.msra.mxu0 %v1060_v5  ;;  %1066 = vmatpush3.bf16.msra.mxu1 %v1387_v8  ;;  %v1113_v56 = vpack.c.bf16 %v788_v54, %v787_v53  ;;  %v790_v57 = vld [vmem:[#allocation9 + $0x18] sm:$0xff] }
  0x4f   :  { %1067 = vmatprep.subr.bf16.mxu1 %v1270_v0  ;;  %1070 = vmatprep.subr.bf16.mxu0 %v1270_v0  ;;  %v1116_v58 = vpack.c.bf16 %v790_v57, %v789_v55  ;;  %p1241_p7 = por %p1240_p6, %p1239_p5 }
  0x51   :  { %959 = vmatmul.mubr.msk.f32.vlgmr.msra.gmra.mrb[0].mxu0 %vm90_vm1, %v80_v11  ;;  %p1242_p8 = pnand %p1241_p7, %p1235_p4 }
  0x52   :  { %1069 = vmatpush3.bf16.msra.mxu1 %v1390_v12  ;;  %1072 = vmatpush3.bf16.msra.mxu0 %v1387_v8 }
  0x53   :  { %1073 = vmatprep.subr.bf16.mxu0 %v1270_v0  ;;  %980 = vmatprep.mubr.msk.f32.mxu0 %vm1271_vm0, %v1272_v1 }
  0x54   :  { %1076 = vmatprep.subr.bf16.mxu1 %v1270_v0 }
  0x55   :  { %970 = vmatmul.mubr.f32.vlgmr.msra.gmra.mrb[0].mxu1 %v1272_v1 }
  0x56   :  { %1075 = vmatpush3.bf16.msra.mxu0 %v1390_v12  ;;  %1078 = vmatpush3.bf16.msra.mxu1 %v1387_v8 }
  0x57   :  { %1079 = vmatprep.subr.bf16.mxu1 %v1270_v0  ;;  %991 = vmatprep.mubr.msk.f32.mxu1 %vm1271_vm0, %v1272_v1 }
  0x58   :  { %1082 = vmatprep.subr.bf16.mxu0 %v1270_v0 }
  0x5a   :  { %1081 = vmatpush3.bf16.msra.mxu1 %v1390_v12 }
  0x5b   :  { %1088 = vmatprep.subr.bf16.mxu1 %v1270_v0 }
 0x124   :  { %v960_v14 = vpop.f32.mrb[0].mxu0 }
 0x125   :  { %v169_v15 = vadd.f32 %v960_v14, %v893_v13  ;;  %v163_v16 = vpop.f32.mrb[1].mxu0 }
 0x126   :  { %v164_v17 = vadd.f32 %v893_v13, %v163_v16 }
 0x127   :  { %174 = vst.msk [vmem:[#allocation2 + $0x8] sm:$0xff] %vm172_vm2, %v169_v15 }
 0x128   :  { %173 = vst.msk [vmem:[#allocation2] sm:$0xff] %vm172_vm2, %v164_v17  ;;  %v249_v18 = vpop.f32.mrb[0].mxu1 }
 0x129   :  { %v971_v19 = vpop.f32.mrb[1].mxu1 }
 0x12e   :  { %v483_v38 = vld [vmem:[#allocation2 + $0x8] sm:$0x3]  ;;  %v559_v43 = vld [vmem:[#allocation2 + $0xa] sm:$0x3]  ;;  %v635_v48 = vld [vmem:[#allocation2 + $0xc] sm:$0x3] }
 0x12f   :  { %v179_v20 = vld [vmem:[#allocation2] sm:$0x3]  ;;  %v255_v23 = vld [vmem:[#allocation2 + $0x2] sm:$0x3]  ;;  %v331_v28 = vld [vmem:[#allocation2 + $0x4] sm:$0x3] }
 0x130   :  { %v253_v21 = vadd.f32 %v249_v18, %v179_v20  ;;  %v407_v33 = vld [vmem:[#allocation2 + $0x6] sm:$0x3]  ;;  %v711_v59 = vld [vmem:[#allocation2 + $0xe] sm:$0x3] }
 0x132   :  { %1128 = vtanh.f32 %v253_v21 }
 0x13c   :  { %v1129_v22 = vpop.eup %1128 }
 0x13d   :  { %981 = vmatmul.mubr.msk.f32.vlgmr.msra.gmra.mrb[2].mxu0 %vm172_vm2, %v1129_v22 }
 0x13e   :  { %1084 = vmatpush3.bf16.msra.mxu0 %v1387_v8  ;;  %1002 = vmatprep.mubr.msk.f32.mxu0 %vm1271_vm0, %v1272_v1 }
 0x13f   :  { %1085 = vmatprep.subr.bf16.mxu0 %v1270_v0 }
 0x142   :  { %1087 = vmatpush3.bf16.msra.mxu0 %v1390_v12 }
 0x143   :  { %1094 = vmatprep.subr.bf16.mxu0 %v1270_v0 }
 0x210   :  { %v325_v24 = vpop.f32.mrb[2].mxu0 }
 0x211   :  { %v329_v25 = vadd.f32 %v325_v24, %v255_v23  ;;  %v982_v26 = vpop.f32.mrb[3].mxu0 }
 0x213   :  { %1130 = vtanh.f32 %v329_v25 }
 0x21d   :  { %v1131_v27 = vpop.eup %1130 }
 0x21e   :  { %992 = vmatmul.mubr.msk.f32.vlgmr.msra.gmra.mrb[2].mxu1 %vm172_vm2, %v1131_v27 }
 0x21f   :  { %1090 = vmatpush3.bf16.msra.mxu1 %v1387_v8  ;;  %1013 = vmatprep.mubr.msk.f32.mxu1 %vm1271_vm0, %v1272_v1 }
 0x220   :  { %1091 = vmatprep.subr.bf16.mxu1 %v1270_v0 }
 0x223   :  { %1093 = vmatpush3.bf16.msra.mxu1 %v1390_v12 }
 0x224   :  { %1100 = vmatprep.subr.bf16.mxu1 %v1270_v0 }
 0x2f1   :  { %v401_v29 = vpop.f32.mrb[2].mxu1 }
 0x2f2   :  { %v405_v30 = vadd.f32 %v401_v29, %v331_v28  ;;  %v993_v31 = vpop.f32.mrb[3].mxu1 }
 0x2f4   :  { %1132 = vtanh.f32 %v405_v30 }
 0x2fe   :  { %v1133_v32 = vpop.eup %1132 }
 0x2ff   :  { %1003 = vmatmul.mubr.msk.f32.vlgmr.msra.gmra.mrb[4].mxu0 %vm172_vm2, %v1133_v32 }
 0x300   :  { %1096 = vmatpush3.bf16.msra.mxu0 %v1387_v8  ;;  %1024 = vmatprep.mubr.msk.f32.mxu0 %vm1271_vm0, %v1272_v1 }
 0x301   :  { %1097 = vmatprep.subr.bf16.mxu0 %v1270_v0 }
 0x304   :  { %1099 = vmatpush3.bf16.msra.mxu0 %v1390_v12 }
 0x305   :  { %1106 = vmatprep.subr.bf16.mxu0 %v1270_v0 }
 0x3d2   :  { %v477_v34 = vpop.f32.mrb[4].mxu0 }
 0x3d3   :  { %v481_v35 = vadd.f32 %v477_v34, %v407_v33  ;;  %v1004_v36 = vpop.f32.mrb[5].mxu0 }
 0x3d5   :  { %1134 = vtanh.f32 %v481_v35 }
 0x3df   :  { %v1135_v37 = vpop.eup %1134 }
 0x3e0   :  { %1014 = vmatmul.mubr.msk.f32.vlgmr.msra.gmra.mrb[4].mxu1 %vm172_vm2, %v1135_v37 }
 0x3e1   :  { %1102 = vmatpush3.bf16.msra.mxu1 %v1387_v8  ;;  %1035 = vmatprep.mubr.msk.f32.mxu1 %vm1271_vm0, %v1272_v1 }
 0x3e2   :  { %1103 = vmatprep.subr.bf16.mxu1 %v1270_v0 }
 0x3e5   :  { %1105 = vmatpush3.bf16.msra.mxu1 %v1390_v12 }
 0x3e6   :  { %1112 = vmatprep.subr.bf16.mxu1 %v1270_v0 }
 0x4b3   :  { %v553_v39 = vpop.f32.mrb[4].mxu1 }
 0x4b4   :  { %v557_v40 = vadd.f32 %v553_v39, %v483_v38  ;;  %v1015_v41 = vpop.f32.mrb[5].mxu1 }
 0x4b6   :  { %1136 = vtanh.f32 %v557_v40 }
 0x4c0   :  { %v1137_v42 = vpop.eup %1136 }
 0x4c1   :  { %1025 = vmatmul.mubr.msk.f32.vlgmr.msra.gmra.mrb[6].mxu0 %vm172_vm2, %v1137_v42 }
 0x4c2   :  { %1108 = vmatpush3.bf16.msra.mxu0 %v1387_v8  ;;  %1046 = vmatprep.mubr.msk.f32.mxu0 %vm1271_vm0, %v1272_v1 }
 0x4c3   :  { %1109 = vmatprep.subr.bf16.mxu0 %v1270_v0 }
 0x4c6   :  { %1111 = vmatpush3.bf16.msra.mxu0 %v1390_v12 }
 0x594   :  { %v629_v44 = vpop.f32.mrb[6].mxu0 }
 0x595   :  { %v633_v45 = vadd.f32 %v629_v44, %v559_v43  ;;  %v1026_v46 = vpop.f32.mrb[7].mxu0 }
 0x597   :  { %1138 = vtanh.f32 %v633_v45 }
 0x5a1   :  { %v1139_v47 = vpop.eup %1138 }
 0x5a2   :  { %1036 = vmatmul.mubr.msk.f32.vlgmr.msra.gmra.mrb[6].mxu1 %vm172_vm2, %v1139_v47 }
 0x5a3   :  { %1057 = vmatprep.mubr.msk.f32.mxu1 %vm1271_vm0, %v1272_v1  ;;  %1114 = vmatpush3.bf16.msra.mxu1 %v1113_v56  ;;  %v903_v1 = vld [vmem:[%s1475_s5] ss:$0 sm:$0xff] }
 0x5a4   :  { %1115 = vmatprep.subr.bf16.mxu1 %v1270_v0 }
 0x5a7   :  { %1117 = vmatpush3.bf16.msra.mxu1 %v1116_v58 }
 0x675   :  { %v705_v49 = vpop.f32.mrb[6].mxu1 }
 0x676   :  { %v709_v50 = vadd.f32 %v705_v49, %v635_v48  ;;  %v1037_v51 = vpop.f32.mrb[7].mxu1 }
 0x678   :  { %1140 = vtanh.f32 %v709_v50 }
 0x682   :  { %v1141_v52 = vpop.eup %1140 }
 0x683   :  { %1047 = vmatmul.mubr.msk.f32.vlgmr.msra.gmra.mrb[8].mxu0 %vm172_vm2, %v1141_v52 }
 0x756   :  { %v781_v60 = vpop.f32.mrb[8].mxu0 }
 0x757   :  { %v785_v61 = vadd.f32 %v781_v60, %v711_v59  ;;  %v1048_v62 = vpop.f32.mrb[9].mxu0 }
 0x759   :  { %1142 = vtanh.f32 %v785_v61 }
 0x763   :  { %v1143_v63 = vpop.eup %1142 }
 0x764   :  { %1058 = vmatmul.mubr.msk.f32.vlgmr.msra.gmra.mrb[8].mxu1 %vm172_vm2, %v1143_v63 }
 0x837   :  { %v867_v2 = vpop.f32.mrb[8].mxu1 }
 0x838   :  { %v868_v3 = vadd.f32 %v903_v1, %v867_v2  ;;  %v1059_v4 = vpop.f32.mrb[9].mxu1 }
 0x83a   :  { %v871_v5 = vmul.f32 0.5, %v868_v3 }
 0x83c   :  { %1144 = vtanh.f32 %v871_v5 }
 0x846   :  { %v1145_v6 = vpop.eup %1144 }
 0x847   :  { %v873_v0 = vadd.f32 1.0, %v1145_v6 }
 0x849   :  { %v874_v7 = vmul.f32 0.5, %v873_v0 }
 0x84b   :  { %875 = vst [vmem:[#allocation11] sm:$0x3] %v874_v7 }
 0x84c   :  { %1245 = shalt.err (!%p1242_p8)
}
 0x84d   :  { %s1246_s26 = scalar_lea.hbm %s1476_s6, 32 }
 0x84e   :  { %p1247_p9 = scmp.ne.s32.totalorder %s1476_s6, %s1246_s26  ;;  %p1250_p10 = scmp.lt.u32.totalorder %s1246_s26, %s1476_s6 }
 0x850   :  { %p1252_p11 = pnand %p1250_p10, %p1247_p9 }
 0x852   :  { %1255 = shalt.err (!%p1252_p11)
}
 0x853   :  { %885 = dma.vmem_to_hbm [thread:$0]  %s883_s22, 32, %s1476_s6, [#allocation5]  }
 0x854   :  { %1262 = dma.done.wait [#allocation5], 32  }
 0x855   :  { %1263 = vsyncadd [#allocation5], 4294967264 }
 0x856   :  { %889 = vsyncpa [#allocation4], 1 }
 0x857   :  { %890 = vsyncpa [#allocation7], 1 }
 0x858   :  { %891 = vsyncpa [#allocation10], 1 }
 0x859   :  { %892 = vsyncpa [#allocation5], 1 }

</bundles_post_ra>
